<compile_context>
chip_gen: v7x
topology: tpu7x:2x2x1
jax: 0.10.0
libtpu: 0.0.40
codegen_flags: <defaults>
</compile_context>

<pallas_src>
import math
import functools

import jax
import jax.numpy as jnp
import numpy as np
from jax import lax
from jax.experimental import pallas as pl
from jax.experimental.pallas import tpu as pltpu


PARAM_ORDER = [
    "ln1_g", "ln1_b",
    "w_qkv", "b_qkv", "wo", "bo",
    "ln2_g", "ln2_b",
    "w1", "b1", "w2", "b2",
]


def _layer_norm(v, g, b, eps=1e-6):
    mu = jnp.mean(v, axis=-1, keepdims=True)
    var = jnp.mean((v - mu) ** 2, axis=-1, keepdims=True)
    return (v - mu) * lax.rsqrt(var + eps) * g + b


def encoder_layer_kernel(
    x_ref, bias_ref,
    ln1_g_ref, ln1_b_ref,
    w_qkv_ref, b_qkv_ref, wo_ref, bo_ref,
    ln2_g_ref, ln2_b_ref,
    w1_ref, b1_ref, w2_ref, b2_ref,
    o_ref,
    *, n_heads, d_k, d_v,
):
    f32 = jnp.float32
    bf16 = jnp.bfloat16
    H, dk, dv = n_heads, d_k, d_v

    x = x_ref[...]                               # [1, S, D] (one batch element per step)
    _, S, D = x.shape
    x2d = x.reshape(S, D)

    # ---- pre-norm + fused dense QKV projection (one lane-wide MXU matmul) ----
    ln1 = _layer_norm(x2d, ln1_g_ref[...], ln1_b_ref[...])
    qkv = jnp.dot(ln1.astype(bf16), w_qkv_ref[...],
                  preferred_element_type=f32) + b_qkv_ref[...]      # [S, H*(2dk+dv)] f32

    # Head split via cheap lane slices + major-dim stack (no replication).
    # 1/sqrt(d_k) is already folded into the q columns of w_qkv / b_qkv.
    q = jnp.stack([qkv[:, h * dk:(h + 1) * dk] for h in range(H)], axis=0)          # [H,S,dk]
    k_off = H * dk
    k = jnp.stack([qkv[:, k_off + h * dk:k_off + (h + 1) * dk] for h in range(H)], axis=0)
    v_off = 2 * H * dk
    v = jnp.stack([qkv[:, v_off + h * dv:v_off + (h + 1) * dv] for h in range(H)], axis=0)  # [H,S,dv]

    # ---- scores + softmax (f32 math, exact divide) ----
    scores = lax.dot_general(                                        # 'hqd,hkd->hqk'
        q.astype(bf16), k.astype(bf16),
        dimension_numbers=(((2,), (2,)), ((0,), (0,))),
        preferred_element_type=f32)                                  # [H, S, S]
    scores = scores + bias_ref[...].reshape(H, S, S)
    m = jnp.max(scores, axis=-1, keepdims=True)
    p = jnp.exp(scores - m)
    p = p / jnp.sum(p, axis=-1, keepdims=True)

    # ---- context; head merge folded into one dense output projection ----
    ctx = lax.dot_general(                                           # 'hqk,hkd->hqd'
        p.astype(bf16), v.astype(bf16),
        dimension_numbers=(((2,), (1,)), ((0,), (0,))),
        preferred_element_type=f32)                                  # [H, S, dv]
    ctx2d = jnp.concatenate([ctx[h] for h in range(H)], axis=1)      # [S, H*dv]
    attn_out = jnp.dot(ctx2d.astype(bf16), wo_ref[...],
                       preferred_element_type=f32) + bo_ref[...]     # [S, D]

    x_res = attn_out + x2d                       # dropout == identity; residual

    # ---- position-wise feed forward (pre-norm, internal residual, ReLU) ----
    ffn_in = _layer_norm(x_res, ln2_g_ref[...], ln2_b_ref[...])
    h1 = jnp.dot(ffn_in.astype(bf16), w1_ref[...],
                 preferred_element_type=f32) + b1_ref[...]
    h1 = jnp.maximum(h1, 0.0)
    out = jnp.dot(h1.astype(bf16), w2_ref[...],
                  preferred_element_type=f32) + b2_ref[...] + x_res

    o_ref[...] = out.reshape(1, S, D)


def encoder_layer(x, bias, prepared, *, n_heads, d_k, d_v):
    B, S, D = x.shape
    H = n_heads

    def const_spec(a):
        nd = a.ndim
        return pl.BlockSpec(a.shape, lambda i, _nd=nd: (0,) * _nd)

    in_specs = [
        pl.BlockSpec((1, S, D), lambda b: (b, 0, 0)),
        pl.BlockSpec((1, H, S, S), lambda b: (b, 0, 0, 0)),
    ] + [const_spec(prepared[name]) for name in PARAM_ORDER]

    kernel = functools.partial(encoder_layer_kernel, n_heads=H, d_k=d_k, d_v=d_v)

    # Rough per-step VMEM estimate -> explicit limit with headroom (cap for v7x 64 MiB).
    d_inner = prepared["w1"].shape[1]
    est = (
        2 * (H * S * S * 4)                      # bias block (double-buffered)
        + 4 * (S * D * 4)                        # x / out blocks (double-buffered)
        + 3 * (H * S * S * 4)                    # scores / p temporaries
        + 2 * (S * H * (2 * d_k + d_v) * 4)      # qkv + head-split copies
        + 2 * (S * max(D, d_inner) * 4)          # ffn temporaries
        + sum(int(np.prod(prepared[n].shape)) * prepared[n].dtype.itemsize
              for n in PARAM_ORDER)              # resident weights
    )
    vmem_limit = int(min(max(4 * est, 16 * 2 ** 20), 64 * 2 ** 20))

    return pl.pallas_call(
        kernel,
        out_shape=jax.ShapeDtypeStruct((B, S, D), jnp.float32),
        grid_spec=pltpu.PrefetchScalarGridSpec(
            num_scalar_prefetch=0,
            grid=(B,),                           # >= 2 parallel steps for B >= 2 (v7x 2 TCs)
            in_specs=in_specs,
            out_specs=pl.BlockSpec((1, S, D), lambda b: (b, 0, 0)),
        ),
        compiler_params=pltpu.CompilerParams(
            dimension_semantics=("parallel",),
            vmem_limit_bytes=vmem_limit,
        ),
    )(x, bias, *[prepared[name] for name in PARAM_ORDER])


def prepare_layer_params(p, *, n_heads, d_k, d_v):
    """Host-side (one-time) fuse/cast into kernel-friendly layouts.

    W_qkv columns: [q (H*d_k) | k (H*d_k) | v (H*d_v)], head-major within each block.
    The 1/sqrt(d_k) attention scale is folded into the q columns (weights AND bias).
    """
    del n_heads, d_v
    bf16 = jnp.bfloat16
    scale = 1.0 / math.sqrt(d_k)
    w_qkv = jnp.concatenate([p["wq"] * scale, p["wk"], p["wv"]], axis=1).astype(bf16)
    b_qkv = jnp.concatenate([p["bq"] * scale, p["bk"], p["bv"]], axis=1).astype(jnp.float32)
    return {
        "ln1_g": p["ln1_g"], "ln1_b": p["ln1_b"],
        "w_qkv": w_qkv, "b_qkv": b_qkv,
        "wo": p["wo"].astype(bf16), "bo": p["bo"],
        "ln2_g": p["ln2_g"], "ln2_b": p["ln2_b"],
        "w1": p["w1"].astype(bf16), "b1": p["b1"],
        "w2": p["w2"].astype(bf16), "b2": p["b2"],
    }


def transformer_encoder(enc_input, bias, layer_params_list, *, n_heads, d_k, d_v):
    # The PyTorch reference feeds the ORIGINAL input to every layer and returns only
    # the last layer's output; layers 0..n-2 are dead work, so only the last layer
    # is executed (identical forward result, no wasted pallas_calls).
    prepared = prepare_layer_params(layer_params_list[-1],
                                    n_heads=n_heads, d_k=d_k, d_v=d_v)
    return encoder_layer(enc_input, bias, prepared,
                         n_heads=n_heads, d_k=d_k, d_v=d_v)


def init_layer_params(key, d_model, n_heads, d_k, d_v, d_inner):
    ks = jax.random.split(key, 6)

    def lin_w(k, din, dout):
        return (jax.random.normal(k, (din, dout), jnp.float32)
                * (1.0 / math.sqrt(din)))

    return {
        "ln1_g": jnp.ones((1, d_model), jnp.float32),
        "ln1_b": jnp.zeros((1, d_model), jnp.float32),
        "wq": lin_w(ks[0], d_model, n_heads * d_k),
        "bq": jnp.zeros((1, n_heads * d_k), jnp.float32),
        "wk": lin_w(ks[1], d_model, n_heads * d_k),
        "bk": jnp.zeros((1, n_heads * d_k), jnp.float32),
        "wv": lin_w(ks[2], d_model, n_heads * d_v),
        "bv": jnp.zeros((1, n_heads * d_v), jnp.float32),
        "wo": lin_w(ks[3], n_heads * d_v, d_model),
        "bo": jnp.zeros((1, d_model), jnp.float32),
        "ln2_g": jnp.ones((1, d_model), jnp.float32),
        "ln2_b": jnp.zeros((1, d_model), jnp.float32),
        "w1": lin_w(ks[4], d_model, d_inner),
        "b1": jnp.zeros((1, d_inner), jnp.float32),
        "w2": lin_w(ks[5], d_inner, d_model),
        "b2": jnp.zeros((1, d_model), jnp.float32),
    }


def reference_forward(x, bias, p, *, n_heads, d_k, d_v):
    """Pure-JAX f32 reference of one pre-norm encoder layer (for sanity checking)."""
    B, S, D = x.shape
    H = n_heads

    def ln(v, g, b):
        mu = v.mean(-1, keepdims=True)
        var = ((v - mu) ** 2).mean(-1, keepdims=True)
        return (v - mu) / jnp.sqrt(var + 1e-6) * g + b

    a_in = ln(x, p["ln1_g"], p["ln1_b"])
    q = (a_in @ p["wq"] + p["bq"]).reshape(B, S, H, d_k).transpose(0, 2, 1, 3)
    k = (a_in @ p["wk"] + p["bk"]).reshape(B, S, H, d_k).transpose(0, 2, 1, 3)
    v = (a_in @ p["wv"] + p["bv"]).reshape(B, S, H, d_v).transpose(0, 2, 1, 3)
    s = jnp.einsum("bhqd,bhkd->bhqk", q, k) / math.sqrt(d_k) + bias
    w = jax.nn.softmax(s, axis=-1)
    ctx = jnp.einsum("bhqk,bhkd->bhqd", w, v).transpose(0, 2, 1, 3).reshape(B, S, H * d_v)
    attn_out = ctx @ p["wo"] + p["bo"]
    x_res = attn_out + x
    f_in = ln(x_res, p["ln2_g"], p["ln2_b"])
    h1 = jnp.maximum(f_in @ p["w1"] + p["b1"], 0.0)
    return h1 @ p["w2"] + p["b2"] + x_res


if __name__ == "__main__":
    # Small, module-consistent config.
    n_layers = 2
    n_heads = 4
    d_k = 8
    d_v = 8
    d_model = 32
    d_inner_hidden = 64
    B, S = 2, 8           # batch_size, n_blocks

    root = jax.random.PRNGKey(0)
    k_in, k_bias, k_par = jax.random.split(root, 3)

    enc_input = jax.random.normal(k_in, (B, S, d_model), jnp.float32)
    bias = jax.random.normal(k_bias, (B, n_heads, S, S), jnp.float32) * 0.1

    layer_keys = jax.random.split(k_par, n_layers)
    layer_params = [
        init_layer_params(layer_keys[i], d_model, n_heads, d_k, d_v, d_inner_hidden)
        for i in range(n_layers)
    ]

    out = transformer_encoder(enc_input, bias, layer_params,
                              n_heads=n_heads, d_k=d_k, d_v=d_v)
    out = jax.block_until_ready(out)
    assert out.shape == (B, S, d_model) and out.dtype == jnp.float32
    assert bool(jnp.all(jnp.isfinite(out)))

    ref = reference_forward(enc_input, bias, layer_params[-1],
                            n_heads=n_heads, d_k=d_k, d_v=d_v)
    max_err = float(jnp.max(jnp.abs(out - ref)))
    assert max_err < 0.1, f"kernel vs reference mismatch: max abs err {max_err}"
    print("KERNEL_OK")
</pallas_src>

<mosaic_0001>
module attributes {stable_mosaic.version = 11 : i64} {
  func.func @encoder_layer_kernel(%arg0: i32, %arg1: memref<1x8x32xf32, #tpu.memory_space<vmem>>, %arg2: memref<1x4x8x8xf32, #tpu.memory_space<vmem>>, %arg3: memref<1x32xf32, #tpu.memory_space<vmem>>, %arg4: memref<1x32xf32, #tpu.memory_space<vmem>>, %arg5: memref<32x96xbf16, #tpu.memory_space<vmem>>, %arg6: memref<1x96xf32, #tpu.memory_space<vmem>>, %arg7: memref<32x32xbf16, #tpu.memory_space<vmem>>, %arg8: memref<1x32xf32, #tpu.memory_space<vmem>>, %arg9: memref<1x32xf32, #tpu.memory_space<vmem>>, %arg10: memref<1x32xf32, #tpu.memory_space<vmem>>, %arg11: memref<32x64xbf16, #tpu.memory_space<vmem>>, %arg12: memref<1x64xf32, #tpu.memory_space<vmem>>, %arg13: memref<64x32xbf16, #tpu.memory_space<vmem>>, %arg14: memref<1x32xf32, #tpu.memory_space<vmem>>, %arg15: memref<1x8x32xf32, #tpu.memory_space<vmem>>) attributes {dimension_semantics = [#tpu.dimension_semantics<parallel>], iteration_bounds = array<i64: 2>, scalar_prefetch = 0 : i64, scratch_operands = 0 : i64, tpu.core_type = #tpu.core_type<tc>, window_params = [{transform_indices = @transform_0, window_bounds = array<i64: 1, 8, 32>}, {transform_indices = @transform_1, window_bounds = array<i64: 1, 4, 8, 8>}, {pipeline_mode = #tpu.pipeline_mode<synchronous>, transform_indices = @transform_2, window_bounds = array<i64: 1, 32>}, {pipeline_mode = #tpu.pipeline_mode<synchronous>, transform_indices = @transform_3, window_bounds = array<i64: 1, 32>}, {pipeline_mode = #tpu.pipeline_mode<synchronous>, transform_indices = @transform_4, window_bounds = array<i64: 32, 96>}, {pipeline_mode = #tpu.pipeline_mode<synchronous>, transform_indices = @transform_5, window_bounds = array<i64: 1, 96>}, {pipeline_mode = #tpu.pipeline_mode<synchronous>, transform_indices = @transform_6, window_bounds = array<i64: 32, 32>}, {pipeline_mode = #tpu.pipeline_mode<synchronous>, transform_indices = @transform_7, window_bounds = array<i64: 1, 32>}, {pipeline_mode = #tpu.pipeline_mode<synchronous>, transform_indices = @transform_8, window_bounds = array<i64: 1, 32>}, {pipeline_mode = #tpu.pipeline_mode<synchronous>, transform_indices = @transform_9, window_bounds = array<i64: 1, 32>}, {pipeline_mode = #tpu.pipeline_mode<synchronous>, transform_indices = @transform_10, window_bounds = array<i64: 32, 64>}, {pipeline_mode = #tpu.pipeline_mode<synchronous>, transform_indices = @transform_11, window_bounds = array<i64: 1, 64>}, {pipeline_mode = #tpu.pipeline_mode<synchronous>, transform_indices = @transform_12, window_bounds = array<i64: 64, 32>}, {pipeline_mode = #tpu.pipeline_mode<synchronous>, transform_indices = @transform_13, window_bounds = array<i64: 1, 32>}, {transform_indices = @transform_14, window_bounds = array<i64: 1, 8, 32>}]} {
    %c0 = arith.constant 0 : index
    %c0_0 = arith.constant 0 : index
    %c0_1 = arith.constant 0 : index
    %0 = vector.load %arg1[%c0, %c0_0, %c0_1] : memref<1x8x32xf32, #tpu.memory_space<vmem>>, vector<1x8x32xf32>
    %1 = vector.shape_cast %0 : vector<1x8x32xf32> to vector<8x32xf32>
    %c0_2 = arith.constant 0 : index
    %c0_3 = arith.constant 0 : index
    %2 = vector.load %arg3[%c0_2, %c0_3] : memref<1x32xf32, #tpu.memory_space<vmem>>, vector<1x32xf32>
    %c0_4 = arith.constant 0 : index
    %c0_5 = arith.constant 0 : index
    %3 = vector.load %arg4[%c0_4, %c0_5] : memref<1x32xf32, #tpu.memory_space<vmem>>, vector<1x32xf32>
    %cst = arith.constant dense<0.000000e+00> : vector<8xf32>
    %4 = vector.multi_reduction <add>, %1, %cst [1] : vector<8x32xf32> to vector<8xf32>
    %5 = vector.shape_cast %4 : vector<8xf32> to vector<8x1xf32>
    %cst_6 = arith.constant 3.200000e+01 : f32
    %6 = vector.broadcast %cst_6 : f32 to vector<8x1xf32>
    %7 = arith.divf %5, %6 : vector<8x1xf32>
    %8 = vector.broadcast %7 : vector<8x1xf32> to vector<8x32xf32>
    %9 = arith.subf %1, %8 : vector<8x32xf32>
    %10 = arith.mulf %9, %9 : vector<8x32xf32>
    %cst_7 = arith.constant dense<0.000000e+00> : vector<8xf32>
    %11 = vector.multi_reduction <add>, %10, %cst_7 [1] : vector<8x32xf32> to vector<8xf32>
    %12 = vector.shape_cast %11 : vector<8xf32> to vector<8x1xf32>
    %cst_8 = arith.constant 3.200000e+01 : f32
    %13 = vector.broadcast %cst_8 : f32 to vector<8x1xf32>
    %14 = arith.divf %12, %13 : vector<8x1xf32>
    %15 = vector.broadcast %7 : vector<8x1xf32> to vector<8x32xf32>
    %16 = arith.subf %1, %15 : vector<8x32xf32>
    %cst_9 = arith.constant 9.99999997E-7 : f32
    %17 = vector.broadcast %cst_9 : f32 to vector<8x1xf32>
    %18 = arith.addf %14, %17 : vector<8x1xf32>
    %19 = math.rsqrt %18 : vector<8x1xf32>
    %20 = vector.broadcast %19 : vector<8x1xf32> to vector<8x32xf32>
    %21 = arith.mulf %16, %20 : vector<8x32xf32>
    %22 = vector.broadcast %2 : vector<1x32xf32> to vector<8x32xf32>
    %23 = arith.mulf %21, %22 : vector<8x32xf32>
    %24 = vector.broadcast %3 : vector<1x32xf32> to vector<8x32xf32>
    %25 = arith.addf %23, %24 : vector<8x32xf32>
    %26 = arith.truncf %25 : vector<8x32xf32> to vector<8x32xbf16>
    %c0_10 = arith.constant 0 : index
    %c0_11 = arith.constant 0 : index
    %27 = vector.load %arg5[%c0_10, %c0_11] : memref<32x96xbf16, #tpu.memory_space<vmem>>, vector<32x96xbf16>
    %cst_12 = arith.constant dense<0.000000e+00> : vector<8x96xf32>
    %28 = tpu.matmul %26, %27, %cst_12 {dimension_numbers = #tpu.dot_dimension_numbers<[1], [0], [0], [1], [0, 0, 1, 1], [], []>} : vector<8x32xbf16>, vector<32x96xbf16>, vector<8x96xf32> -> vector<8x96xf32>
    %c0_13 = arith.constant 0 : index
    %c0_14 = arith.constant 0 : index
    %29 = vector.load %arg6[%c0_13, %c0_14] : memref<1x96xf32, #tpu.memory_space<vmem>>, vector<1x96xf32>
    %30 = vector.broadcast %29 : vector<1x96xf32> to vector<8x96xf32>
    %31 = arith.addf %28, %30 : vector<8x96xf32>
    %32 = vector.extract_strided_slice %31 {offsets = [0, 0], sizes = [8, 8], strides = [1, 1]} : vector<8x96xf32> to vector<8x8xf32>
    %33 = vector.extract_strided_slice %31 {offsets = [0, 8], sizes = [8, 8], strides = [1, 1]} : vector<8x96xf32> to vector<8x8xf32>
    %34 = vector.extract_strided_slice %31 {offsets = [0, 16], sizes = [8, 8], strides = [1, 1]} : vector<8x96xf32> to vector<8x8xf32>
    %35 = vector.extract_strided_slice %31 {offsets = [0, 24], sizes = [8, 8], strides = [1, 1]} : vector<8x96xf32> to vector<8x8xf32>
    %36 = vector.shape_cast %32 : vector<8x8xf32> to vector<1x8x8xf32>
    %37 = vector.shape_cast %33 : vector<8x8xf32> to vector<1x8x8xf32>
    %38 = vector.shape_cast %34 : vector<8x8xf32> to vector<1x8x8xf32>
    %39 = vector.shape_cast %35 : vector<8x8xf32> to vector<1x8x8xf32>
    %40 = tpu.concatenate %36, %37, %38, %39 in 0 : vector<1x8x8xf32>, vector<1x8x8xf32>, vector<1x8x8xf32>, vector<1x8x8xf32> -> vector<4x8x8xf32>
    %41 = vector.extract_strided_slice %31 {offsets = [0, 32], sizes = [8, 8], strides = [1, 1]} : vector<8x96xf32> to vector<8x8xf32>
    %42 = vector.extract_strided_slice %31 {offsets = [0, 40], sizes = [8, 8], strides = [1, 1]} : vector<8x96xf32> to vector<8x8xf32>
    %43 = vector.extract_strided_slice %31 {offsets = [0, 48], sizes = [8, 8], strides = [1, 1]} : vector<8x96xf32> to vector<8x8xf32>
    %44 = vector.extract_strided_slice %31 {offsets = [0, 56], sizes = [8, 8], strides = [1, 1]} : vector<8x96xf32> to vector<8x8xf32>
    %45 = vector.shape_cast %41 : vector<8x8xf32> to vector<1x8x8xf32>
    %46 = vector.shape_cast %42 : vector<8x8xf32> to vector<1x8x8xf32>
    %47 = vector.shape_cast %43 : vector<8x8xf32> to vector<1x8x8xf32>
    %48 = vector.shape_cast %44 : vector<8x8xf32> to vector<1x8x8xf32>
    %49 = tpu.concatenate %45, %46, %47, %48 in 0 : vector<1x8x8xf32>, vector<1x8x8xf32>, vector<1x8x8xf32>, vector<1x8x8xf32> -> vector<4x8x8xf32>
    %50 = vector.extract_strided_slice %31 {offsets = [0, 64], sizes = [8, 8], strides = [1, 1]} : vector<8x96xf32> to vector<8x8xf32>
    %51 = vector.extract_strided_slice %31 {offsets = [0, 72], sizes = [8, 8], strides = [1, 1]} : vector<8x96xf32> to vector<8x8xf32>
    %52 = vector.extract_strided_slice %31 {offsets = [0, 80], sizes = [8, 8], strides = [1, 1]} : vector<8x96xf32> to vector<8x8xf32>
    %53 = vector.extract_strided_slice %31 {offsets = [0, 88], sizes = [8, 8], strides = [1, 1]} : vector<8x96xf32> to vector<8x8xf32>
    %54 = vector.shape_cast %50 : vector<8x8xf32> to vector<1x8x8xf32>
    %55 = vector.shape_cast %51 : vector<8x8xf32> to vector<1x8x8xf32>
    %56 = vector.shape_cast %52 : vector<8x8xf32> to vector<1x8x8xf32>
    %57 = vector.shape_cast %53 : vector<8x8xf32> to vector<1x8x8xf32>
    %58 = tpu.concatenate %54, %55, %56, %57 in 0 : vector<1x8x8xf32>, vector<1x8x8xf32>, vector<1x8x8xf32>, vector<1x8x8xf32> -> vector<4x8x8xf32>
    %59 = arith.truncf %40 : vector<4x8x8xf32> to vector<4x8x8xbf16>
    %60 = arith.truncf %49 : vector<4x8x8xf32> to vector<4x8x8xbf16>
    %cst_15 = arith.constant dense<0.000000e+00> : vector<4x8x8xf32>
    %61 = tpu.matmul %59, %60, %cst_15 {dimension_numbers = #tpu.dot_dimension_numbers<[2], [2], [1], [1], [0, 0, 0, 1, 1, 1], [0], [0]>} : vector<4x8x8xbf16>, vector<4x8x8xbf16>, vector<4x8x8xf32> -> vector<4x8x8xf32>
    %c0_16 = arith.constant 0 : index
    %c0_17 = arith.constant 0 : index
    %c0_18 = arith.constant 0 : index
    %c0_19 = arith.constant 0 : index
    %62 = vector.load %arg2[%c0_16, %c0_17, %c0_18, %c0_19] : memref<1x4x8x8xf32, #tpu.memory_space<vmem>>, vector<1x4x8x8xf32>
    %63 = vector.shape_cast %62 : vector<1x4x8x8xf32> to vector<4x8x8xf32>
    %64 = arith.addf %61, %63 : vector<4x8x8xf32>
    %cst_20 = arith.constant dense<0xFF800000> : vector<4x8xf32>
    %65 = vector.multi_reduction <maximumf>, %64, %cst_20 [2] : vector<4x8x8xf32> to vector<4x8xf32>
    %66 = vector.shape_cast %65 : vector<4x8xf32> to vector<4x8x1xf32>
    %67 = vector.broadcast %66 : vector<4x8x1xf32> to vector<4x8x8xf32>
    %68 = arith.subf %64, %67 : vector<4x8x8xf32>
    %69 = math.exp %68 : vector<4x8x8xf32>
    %cst_21 = arith.constant dense<0.000000e+00> : vector<4x8xf32>
    %70 = vector.multi_reduction <add>, %69, %cst_21 [2] : vector<4x8x8xf32> to vector<4x8xf32>
    %71 = vector.shape_cast %70 : vector<4x8xf32> to vector<4x8x1xf32>
    %72 = vector.broadcast %71 : vector<4x8x1xf32> to vector<4x8x8xf32>
    %73 = arith.divf %69, %72 : vector<4x8x8xf32>
    %74 = arith.truncf %73 : vector<4x8x8xf32> to vector<4x8x8xbf16>
    %75 = arith.truncf %58 : vector<4x8x8xf32> to vector<4x8x8xbf16>
    %cst_22 = arith.constant dense<0.000000e+00> : vector<4x8x8xf32>
    %76 = tpu.matmul %74, %75, %cst_22 {dimension_numbers = #tpu.dot_dimension_numbers<[2], [1], [1], [2], [0, 0, 0, 1, 1, 2], [0], [0]>} : vector<4x8x8xbf16>, vector<4x8x8xbf16>, vector<4x8x8xf32> -> vector<4x8x8xf32>
    %77 = vector.extract_strided_slice %76 {offsets = [0, 0, 0], sizes = [1, 8, 8], strides = [1, 1, 1]} : vector<4x8x8xf32> to vector<1x8x8xf32>
    %78 = vector.shape_cast %77 : vector<1x8x8xf32> to vector<8x8xf32>
    %79 = vector.extract_strided_slice %76 {offsets = [1, 0, 0], sizes = [1, 8, 8], strides = [1, 1, 1]} : vector<4x8x8xf32> to vector<1x8x8xf32>
    %80 = vector.shape_cast %79 : vector<1x8x8xf32> to vector<8x8xf32>
    %81 = vector.extract_strided_slice %76 {offsets = [2, 0, 0], sizes = [1, 8, 8], strides = [1, 1, 1]} : vector<4x8x8xf32> to vector<1x8x8xf32>
    %82 = vector.shape_cast %81 : vector<1x8x8xf32> to vector<8x8xf32>
    %83 = vector.extract_strided_slice %76 {offsets = [3, 0, 0], sizes = [1, 8, 8], strides = [1, 1, 1]} : vector<4x8x8xf32> to vector<1x8x8xf32>
    %84 = vector.shape_cast %83 : vector<1x8x8xf32> to vector<8x8xf32>
    %85 = tpu.concatenate %78, %80, %82, %84 in 1 : vector<8x8xf32>, vector<8x8xf32>, vector<8x8xf32>, vector<8x8xf32> -> vector<8x32xf32>
    %86 = arith.truncf %85 : vector<8x32xf32> to vector<8x32xbf16>
    %c0_23 = arith.constant 0 : index
    %c0_24 = arith.constant 0 : index
    %87 = vector.load %arg7[%c0_23, %c0_24] : memref<32x32xbf16, #tpu.memory_space<vmem>>, vector<32x32xbf16>
    %cst_25 = arith.constant dense<0.000000e+00> : vector<8x32xf32>
    %88 = tpu.matmul %86, %87, %cst_25 {dimension_numbers = #tpu.dot_dimension_numbers<[1], [0], [0], [1], [0, 0, 1, 1], [], []>} : vector<8x32xbf16>, vector<32x32xbf16>, vector<8x32xf32> -> vector<8x32xf32>
    %c0_26 = arith.constant 0 : index
    %c0_27 = arith.constant 0 : index
    %89 = vector.load %arg8[%c0_26, %c0_27] : memref<1x32xf32, #tpu.memory_space<vmem>>, vector<1x32xf32>
    %90 = vector.broadcast %89 : vector<1x32xf32> to vector<8x32xf32>
    %91 = arith.addf %88, %90 : vector<8x32xf32>
    %92 = arith.addf %91, %1 : vector<8x32xf32>
    %c0_28 = arith.constant 0 : index
    %c0_29 = arith.constant 0 : index
    %93 = vector.load %arg9[%c0_28, %c0_29] : memref<1x32xf32, #tpu.memory_space<vmem>>, vector<1x32xf32>
    %c0_30 = arith.constant 0 : index
    %c0_31 = arith.constant 0 : index
    %94 = vector.load %arg10[%c0_30, %c0_31] : memref<1x32xf32, #tpu.memory_space<vmem>>, vector<1x32xf32>
    %cst_32 = arith.constant dense<0.000000e+00> : vector<8xf32>
    %95 = vector.multi_reduction <add>, %92, %cst_32 [1] : vector<8x32xf32> to vector<8xf32>
    %96 = vector.shape_cast %95 : vector<8xf32> to vector<8x1xf32>
    %cst_33 = arith.constant 3.200000e+01 : f32
    %97 = vector.broadcast %cst_33 : f32 to vector<8x1xf32>
    %98 = arith.divf %96, %97 : vector<8x1xf32>
    %99 = vector.broadcast %98 : vector<8x1xf32> to vector<8x32xf32>
    %100 = arith.subf %92, %99 : vector<8x32xf32>
    %101 = arith.mulf %100, %100 : vector<8x32xf32>
    %cst_34 = arith.constant dense<0.000000e+00> : vector<8xf32>
    %102 = vector.multi_reduction <add>, %101, %cst_34 [1] : vector<8x32xf32> to vector<8xf32>
    %103 = vector.shape_cast %102 : vector<8xf32> to vector<8x1xf32>
    %cst_35 = arith.constant 3.200000e+01 : f32
    %104 = vector.broadcast %cst_35 : f32 to vector<8x1xf32>
    %105 = arith.divf %103, %104 : vector<8x1xf32>
    %106 = vector.broadcast %98 : vector<8x1xf32> to vector<8x32xf32>
    %107 = arith.subf %92, %106 : vector<8x32xf32>
    %cst_36 = arith.constant 9.99999997E-7 : f32
    %108 = vector.broadcast %cst_36 : f32 to vector<8x1xf32>
    %109 = arith.addf %105, %108 : vector<8x1xf32>
    %110 = math.rsqrt %109 : vector<8x1xf32>
    %111 = vector.broadcast %110 : vector<8x1xf32> to vector<8x32xf32>
    %112 = arith.mulf %107, %111 : vector<8x32xf32>
    %113 = vector.broadcast %93 : vector<1x32xf32> to vector<8x32xf32>
    %114 = arith.mulf %112, %113 : vector<8x32xf32>
    %115 = vector.broadcast %94 : vector<1x32xf32> to vector<8x32xf32>
    %116 = arith.addf %114, %115 : vector<8x32xf32>
    %117 = arith.truncf %116 : vector<8x32xf32> to vector<8x32xbf16>
    %c0_37 = arith.constant 0 : index
    %c0_38 = arith.constant 0 : index
    %118 = vector.load %arg11[%c0_37, %c0_38] : memref<32x64xbf16, #tpu.memory_space<vmem>>, vector<32x64xbf16>
    %cst_39 = arith.constant dense<0.000000e+00> : vector<8x64xf32>
    %119 = tpu.matmul %117, %118, %cst_39 {dimension_numbers = #tpu.dot_dimension_numbers<[1], [0], [0], [1], [0, 0, 1, 1], [], []>} : vector<8x32xbf16>, vector<32x64xbf16>, vector<8x64xf32> -> vector<8x64xf32>
    %c0_40 = arith.constant 0 : index
    %c0_41 = arith.constant 0 : index
    %120 = vector.load %arg12[%c0_40, %c0_41] : memref<1x64xf32, #tpu.memory_space<vmem>>, vector<1x64xf32>
    %121 = vector.broadcast %120 : vector<1x64xf32> to vector<8x64xf32>
    %122 = arith.addf %119, %121 : vector<8x64xf32>
    %cst_42 = arith.constant 0.000000e+00 : f32
    %123 = vector.broadcast %cst_42 : f32 to vector<8x64xf32>
    %124 = arith.maximumf %122, %123 : vector<8x64xf32>
    %125 = arith.truncf %124 : vector<8x64xf32> to vector<8x64xbf16>
    %c0_43 = arith.constant 0 : index
    %c0_44 = arith.constant 0 : index
    %126 = vector.load %arg13[%c0_43, %c0_44] : memref<64x32xbf16, #tpu.memory_space<vmem>>, vector<64x32xbf16>
    %cst_45 = arith.constant dense<0.000000e+00> : vector<8x32xf32>
    %127 = tpu.matmul %125, %126, %cst_45 {dimension_numbers = #tpu.dot_dimension_numbers<[1], [0], [0], [1], [0, 0, 1, 1], [], []>} : vector<8x64xbf16>, vector<64x32xbf16>, vector<8x32xf32> -> vector<8x32xf32>
    %c0_46 = arith.constant 0 : index
    %c0_47 = arith.constant 0 : index
    %128 = vector.load %arg14[%c0_46, %c0_47] : memref<1x32xf32, #tpu.memory_space<vmem>>, vector<1x32xf32>
    %129 = vector.broadcast %128 : vector<1x32xf32> to vector<8x32xf32>
    %130 = arith.addf %127, %129 : vector<8x32xf32>
    %131 = arith.addf %130, %92 : vector<8x32xf32>
    %132 = vector.shape_cast %131 : vector<8x32xf32> to vector<1x8x32xf32>
    %c0_48 = arith.constant 0 : index
    %c0_49 = arith.constant 0 : index
    %c0_50 = arith.constant 0 : index
    %133 = vector.load %arg15[%c0_48, %c0_49, %c0_50] : memref<1x8x32xf32, #tpu.memory_space<vmem>>, vector<1x8x32xf32>
    tpu.vector_store %arg15[%c0_48, %c0_49, %c0_50], %132 {strides = array<i32>} : memref<1x8x32xf32, #tpu.memory_space<vmem>>, vector<1x8x32xf32>,
    return
  }
  func.func @transform_0(%arg0: i32) -> (i32, i32, i32) {
    %c0_i32 = arith.constant 0 : i32
    %c0_i32_0 = arith.constant 0 : i32
    %c0_i32_1 = arith.constant 0 : i32
    return %arg0, %c0_i32, %c0_i32_0 : i32, i32, i32
  }
  func.func @transform_1(%arg0: i32) -> (i32, i32, i32, i32) {
    %c0_i32 = arith.constant 0 : i32
    %c0_i32_0 = arith.constant 0 : i32
    %c0_i32_1 = arith.constant 0 : i32
    %c0_i32_2 = arith.constant 0 : i32
    return %arg0, %c0_i32, %c0_i32_0, %c0_i32_1 : i32, i32, i32, i32
  }
  func.func @transform_2(%arg0: i32) -> (i32, i32) {
    %c0_i32 = arith.constant 0 : i32
    %c0_i32_0 = arith.constant 0 : i32
    %c0_i32_1 = arith.constant 0 : i32
    return %c0_i32, %c0_i32_0 : i32, i32
  }
  func.func @transform_3(%arg0: i32) -> (i32, i32) {
    %c0_i32 = arith.constant 0 : i32
    %c0_i32_0 = arith.constant 0 : i32
    %c0_i32_1 = arith.constant 0 : i32
    return %c0_i32, %c0_i32_0 : i32, i32
  }
  func.func @transform_4(%arg0: i32) -> (i32, i32) {
    %c0_i32 = arith.constant 0 : i32
    %c0_i32_0 = arith.constant 0 : i32
    %c0_i32_1 = arith.constant 0 : i32
    return %c0_i32, %c0_i32_0 : i32, i32
  }
  func.func @transform_5(%arg0: i32) -> (i32, i32) {
    %c0_i32 = arith.constant 0 : i32
    %c0_i32_0 = arith.constant 0 : i32
    %c0_i32_1 = arith.constant 0 : i32
    return %c0_i32, %c0_i32_0 : i32, i32
  }
  func.func @transform_6(%arg0: i32) -> (i32, i32) {
    %c0_i32 = arith.constant 0 : i32
    %c0_i32_0 = arith.constant 0 : i32
    %c0_i32_1 = arith.constant 0 : i32
    return %c0_i32, %c0_i32_0 : i32, i32
  }
  func.func @transform_7(%arg0: i32) -> (i32, i32) {
    %c0_i32 = arith.constant 0 : i32
    %c0_i32_0 = arith.constant 0 : i32
    %c0_i32_1 = arith.constant 0 : i32
    return %c0_i32, %c0_i32_0 : i32, i32
  }
  func.func @transform_8(%arg0: i32) -> (i32, i32) {
    %c0_i32 = arith.constant 0 : i32
    %c0_i32_0 = arith.constant 0 : i32
    %c0_i32_1 = arith.constant 0 : i32
    return %c0_i32, %c0_i32_0 : i32, i32
  }
  func.func @transform_9(%arg0: i32) -> (i32, i32) {
    %c0_i32 = arith.constant 0 : i32
    %c0_i32_0 = arith.constant 0 : i32
    %c0_i32_1 = arith.constant 0 : i32
    return %c0_i32, %c0_i32_0 : i32, i32
  }
  func.func @transform_10(%arg0: i32) -> (i32, i32) {
    %c0_i32 = arith.constant 0 : i32
    %c0_i32_0 = arith.constant 0 : i32
    %c0_i32_1 = arith.constant 0 : i32
    return %c0_i32, %c0_i32_0 : i32, i32
  }
  func.func @transform_11(%arg0: i32) -> (i32, i32) {
    %c0_i32 = arith.constant 0 : i32
    %c0_i32_0 = arith.constant 0 : i32
    %c0_i32_1 = arith.constant 0 : i32
    return %c0_i32, %c0_i32_0 : i32, i32
  }
  func.func @transform_12(%arg0: i32) -> (i32, i32) {
    %c0_i32 = arith.constant 0 : i32
    %c0_i32_0 = arith.constant 0 : i32
    %c0_i32_1 = arith.constant 0 : i32
    return %c0_i32, %c0_i32_0 : i32, i32
  }
  func.func @transform_13(%arg0: i32) -> (i32, i32) {
    %c0_i32 = arith.constant 0 : i32
    %c0_i32_0 = arith.constant 0 : i32
    %c0_i32_1 = arith.constant 0 : i32
    return %c0_i32, %c0_i32_0 : i32, i32
  }
  func.func @transform_14(%arg0: i32) -> (i32, i32, i32) {
    %c0_i32 = arith.constant 0 : i32
    %c0_i32_0 = arith.constant 0 : i32
    %c0_i32_1 = arith.constant 0 : i32
    return %arg0, %c0_i32, %c0_i32_0 : i32, i32, i32
  }
}

</mosaic_0001>

<bundles_post_ra>
// kernel: tpu_custom_call.1
= control target key start
LH: loop header
LB: loop body
LE: loop exit
PB: predicated region body
PF: predicated region fallthrough
CT: control target
= control target key end

     0   :  { %s2550_s0 = inlined_call_operand.vmem [shape: f32[2,8,32], index: 0, kind: input, shape index: {}]   ;;  %s2551_s1 = inlined_call_operand.hbm [shape: f32[2,4,8,8], index: 1, kind: input, shape index: {}]   ;;  %s2552_s2 = inlined_call_operand.vmem [shape: f32[1,32], index: 2, kind: input, shape index: {}]   ;;  %s2553_s3 = inlined_call_operand.vmem [shape: f32[1,32], index: 3, kind: input, shape index: {}]   ;;  %s2554_s4 = inlined_call_operand.vmem [shape: bf16[32,96], index: 4, kind: input, shape index: {}]   ;;  %s2555_s5 = inlined_call_operand.hbm [shape: f32[1,96], index: 5, kind: input, shape index: {}]   ;;  %s2556_s6 = inlined_call_operand.vmem [shape: bf16[32,32], index: 6, kind: input, shape index: {}]   ;;  %s2557_s7 = inlined_call_operand.hbm [shape: f32[1,32], index: 7, kind: input, shape index: {}]   ;;  %s2558_s8 = inlined_call_operand.hbm [shape: f32[1,32], index: 8, kind: input, shape index: {}]   ;;  %s2559_s9 = inlined_call_operand.hbm [shape: f32[1,32], index: 9, kind: input, shape index: {}]   ;;  %s2560_s10 = inlined_call_operand.vmem [shape: bf16[32,64], index: 10, kind: input, shape index: {}]   ;;  %s2561_s11 = inlined_call_operand.vmem [shape: f32[1,64], index: 11, kind: input, shape index: {}]   ;;  %s2562_s12 = inlined_call_operand.vmem [shape: bf16[64,32], index: 12, kind: input, shape index: {}]   ;;  %s2563_s13 = inlined_call_operand.vmem [shape: f32[1,32], index: 13, kind: input, shape index: {}]   ;;  %s2564_s14 = inlined_call_operand.hbm [shape: f32[2,8,32], index: 14, kind: output, shape index: {}]  }
   0x1   :  { %2572 = sst [smem:[#allocation18_spill]] %s2561_s11 }
   0x2   :  { %2573 = sst [smem:[#allocation19_spill]] %s2562_s12 }
   0x3   :  { %2574 = sst [smem:[#allocation20_spill]] %s2563_s13 }
   0x4   :  { %2575 = sst [smem:[#allocation21_spill]] %s2564_s14 }
   0x5   :  { %19 = vsyncpa [#allocation3], 0 }
   0x6   :  { %21 = vsyncpa [#allocation3 + $0x1], 0 }
   0x7   :  { %22 = vsyncpa [#allocation6], 0 }
   0x8   :  { %23 = vsyncpa [#allocation9], 0 }
   0x9   :  { %24 = vsyncpa [#allocation4], 0 }
   0xa   :  { %26 = vsyncpa [#allocation4 + $0x1], 0  ;;  %s2118_s29 = smov 0   ;;  %s2120_s30 = smov 0  }
   0xb   :  { %s2122_s15 = smov 0   ;;  %s2124_s16 = smov 0  }
   0xc LB: > { %2576 = sst [smem:[#allocation16_spill]] %s2011_s29  ;;  %s2139_s17 = sadd.s32 4294967295, %s2023_s16   ;;  %s2023_s16 = sphi %s2124_s16, %s2603_s16   ;;  %s2019_s15 = sphi %s2122_s15, %s2602_s15   ;;  %s2015_s30 = sphi %s2120_s30, %s2601_s30   ;;  %s2011_s29 = sphi %s2118_s29, %s2600_s29  }
   0xd   : > { %s1511_s18 = sadd.s32 4294967294, %s2023_s16   ;;  %p78_p0 = scmp.ne.s32.totalorder %s2015_s30, %s2011_s29 }
   0xe   : > { %p2568_p1 = scmp.eq.s32.totalorder %s2139_s17, 0  ;;  %p360_p3 = scmp.eq.s32.totalorder %s1511_s18, 1 }
   0xf   : > { %p1512_p5 = scmp.ge.s32.totalorder %s2023_s16, 1  ;;  %p367_p7 = scmp.lt.s32.totalorder %s2023_s16, 3 }
  0x10   : > { %p2148_p4 = por %p2568_p1, %p78_p0  ;;  %p2153_p6 = por %p360_p3, %p78_p0 }
  0x11   : > { %p2158_p8 = pnand %p1512_p5, %p367_p7  ;;  %s2025_s22 = smov [#allocation5]  }
  0x12   : > { %s2577_s19 = scalar_select %p2148_p4, 1, 0 }
  0x13   : > { %s2578_s20 = scalar_select %p2153_p6, 1, 0 }
  0x14   : > { %s2580_s21 = scalar_select %p2158_p8, 1, 0 }
  0x15   : > { %2579 = sst [smem:[#allocation17_spill]] %s2578_s20  ;;  %s389_s23 = sshll.u32 %s2025_s22, 4  ;;  %s390_s23 = int_to_ptr.vmem [resolvable:$true] %s389_s23 }
  0x16   : > { %p1698_p10 = pneg %p2158_p8  ;;  %s2026_s24 = smov [#allocation8]  }
  0x17   : > { %s414_s25 = sshll.u32 %s2026_s24, 4  ;;  %s2027_s27 = smov [#allocation7]   ;;  %s2171_s25 = int_to_ptr.vmem [resolvable:$true] %s414_s25 }
  0x18   : > { %p2167_p11 = pnand %p1698_p10, %p2568_p1  ;;  %s403_s28 = sshll.u32 %s2027_s27, 4  ;;  %s2173_s28 = int_to_ptr.vmem [resolvable:$true] %s403_s28 }
  0x19   : > { %s1807_s20 = scalar_lea.hbm %s2555_s5, 16 }
  0x1a   : > { %p1808_p12 = scmp.ne.s32.totalorder %s2555_s5, %s1807_s20  ;;  %p2183_p13 = pneg %p2167_p11 }
  0x1b   : > { %p1814_p5 = scmp.lt.u32.totalorder %s1807_s20, %s2555_s5 }
  0x1c   : > { %p1810_p0 = pnand %p2183_p13, %p1808_p12 }
  0x1e   : > { %p1811_p3 = pneg %p1810_p0 }
  0x20   : > { %p1816_p7 = pnand %p1814_p5, %p1811_p3 }
  0x22   : > { %1819 = shalt.err (!%p1816_p7)
}
  0x23   : > { %s1820_s18 = scalar_lea.vmem %s390_s23, 16  ;;  %s1827_s14 = scalar_lea.vmem %s390_s23, 32 }
  0x24   : > { %p1821_p10 = scmp.ne.s32.totalorder %s390_s23, %s1820_s18  ;;  %p1828_p2 = scmp.lt.s32.totalorder %s390_s23, %s390_s23 }
  0x25   : > { %p1829_p6 = scmp.lt.s32.totalorder %s1827_s14, %s1820_s18 }
  0x26   : > { %p1823_p9 = pnand %p1821_p10, %p2183_p13 }
  0x27   : > { %p1830_p4 = por %p1829_p6, %p1828_p2 }
  0x28   : > { %p1824_p1 = pneg %p1823_p9 }
  0x2a   : > { %p1831_p8 = pnand %p1830_p4, %p1824_p1 }
  0x2c   : > { %1834 = shalt.err (!%p1831_p8)
}
  0x2d   : > { %1701 = dma.hbm_to_vmem [thread:$0]  (!%p2167_p11), %s2555_s5, 16, %s390_s23, [#allocation6]  }
  0x2e   : > { %s1835_s27 = scalar_lea.hbm %s2558_s8, 16 }
  0x2f   : > { %p1836_p9 = scmp.ne.s32.totalorder %s2558_s8, %s1835_s27  ;;  %p1842_p1 = scmp.lt.u32.totalorder %s1835_s27, %s2558_s8 }
  0x31   : > { %p1838_p12 = pnand %p1836_p9, %p2183_p13 }
  0x33   : > { %p1839_p2 = pneg %p1838_p12 }
  0x35   : > { %p1844_p4 = pnand %p1842_p1, %p1839_p2 }
  0x37   : > { %1847 = shalt.err (!%p1844_p4)
}
  0x38   : > { %s1848_s23 = scalar_lea.vmem %s2171_s25, 16  ;;  %s1855_s11 = scalar_lea.vmem %s2171_s25, 32 }
  0x39   : > { %p1849_p6 = scmp.ne.s32.totalorder %s2171_s25, %s1848_s23  ;;  %p1856_p3 = scmp.lt.s32.totalorder %s2171_s25, %s2171_s25 }
  0x3a   : > { %p1857_p5 = scmp.lt.s32.totalorder %s1855_s11, %s1848_s23 }
  0x3b   : > { %p1851_p8 = pnand %p1849_p6, %p2183_p13 }
  0x3c   : > { %p1858_p7 = por %p1857_p5, %p1856_p3 }
  0x3d   : > { %p1852_p0 = pneg %p1851_p8 }
  0x3f   : > { %p1859_p10 = pnand %p1858_p7, %p1852_p0 }
  0x41   : > { %1862 = shalt.err (!%p1859_p10)
}
  0x42   : > { %1707 = dma.hbm_to_vmem [thread:$0]  (!%p2167_p11), %s2558_s8, 16, %s2171_s25, [#allocation9]  }
  0x43   : > { %s1863_s20 = scalar_lea.hbm %s2557_s7, 16 }
  0x44   : > { %p1864_p9 = scmp.ne.s32.totalorder %s2557_s7, %s1863_s20  ;;  %p1870_p1 = scmp.lt.u32.totalorder %s1863_s20, %s2557_s7 }
  0x46   : > { %p1866_p12 = pnand %p1864_p9, %p2183_p13 }
  0x48   : > { %p1867_p2 = pneg %p1866_p12 }
  0x4a   : > { %p1872_p4 = pnand %p1870_p1, %p1867_p2 }
  0x4c   : > { %1875 = shalt.err (!%p1872_p4)
}
  0x4d   : > { %s1876_s25 = scalar_lea.vmem %s2173_s28, 16  ;;  %s1883_s11 = scalar_lea.vmem %s2173_s28, 32 }
  0x4e   : > { %p1877_p6 = scmp.ne.s32.totalorder %s2173_s28, %s1876_s25  ;;  %p1884_p3 = scmp.lt.s32.totalorder %s2173_s28, %s2173_s28 }
  0x4f   : > { %p1885_p5 = scmp.lt.s32.totalorder %s1883_s11, %s1876_s25 }
  0x50   : > { %p1879_p8 = pnand %p1877_p6, %p2183_p13 }
  0x51   : > { %p1886_p7 = por %p1885_p5, %p1884_p3 }
  0x52   : > { %p1880_p0 = pneg %p1879_p8 }
  0x54   : > { %p1887_p10 = pnand %p1886_p7, %p1880_p0 }
  0x56   : > { %1890 = shalt.err (!%p1887_p10)
}
  0x57   : > { %1704 = dma.hbm_to_vmem [thread:$0]  (!%p2167_p11), %s2557_s7, 16, %s2173_s28, [#allocation6]  }
  0x58   : > { %s2028_s22 = smov [#allocation10]   ;;  %s1891_s18 = scalar_lea.hbm %s2559_s9, 16 }
  0x59   : > { %s425_s13 = sshll.u32 %s2028_s22, 4  ;;  %p1892_p9 = scmp.ne.s32.totalorder %s2559_s9, %s1891_s18  ;;  %s426_s13 = int_to_ptr.vmem [resolvable:$true] %s425_s13 }
  0x5a   : > { %p1898_p1 = scmp.lt.u32.totalorder %s1891_s18, %s2559_s9 }
  0x5b   : > { %p1894_p12 = pnand %p1892_p9, %p2183_p13 }
  0x5d   : > { %p1895_p2 = pneg %p1894_p12 }
  0x5f   : > { %p1900_p4 = pnand %p1898_p1, %p1895_p2 }
  0x61   : > { %1903 = shalt.err (!%p1900_p4)
}
  0x62   : > { %s1904_s28 = scalar_lea.vmem %s426_s13, 16  ;;  %s1911_s12 = scalar_lea.vmem %s426_s13, 32 }
  0x63   : > { %p1905_p6 = scmp.ne.s32.totalorder %s426_s13, %s1904_s28  ;;  %p1912_p3 = scmp.lt.s32.totalorder %s426_s13, %s426_s13 }
  0x64   : > { %p1913_p5 = scmp.lt.s32.totalorder %s1911_s12, %s1904_s28 }
  0x65   : > { %p1907_p8 = pnand %p1905_p6, %p2183_p13 }
  0x66   : > { %p1914_p7 = por %p1913_p5, %p1912_p3 }
  0x67   : > { %p1908_p0 = pneg %p1907_p8 }
  0x69   : > { %p1915_p10 = pnand %p1914_p7, %p1908_p0 }
  0x6b   : > { %1918 = shalt.err (!%p1915_p10)
}
  0x6c   : > { %1710 = dma.hbm_to_vmem [thread:$0]  (!%p2167_p11), %s2559_s9, 16, %s426_s13, [#allocation9]  }
  0x6d   : > { %s2266_s24 = sadd.s32 1, %s2023_s16   ;;  %s65_s20 = sadd.s32 1, %s2019_s15 }
  0x6e   : > { %s62_s26 = ssub.s32 %s2023_s16, %s2266_s24  ;;  %p72_p13 = scmp.ne.s32.totalorder %s2019_s15, %s2015_s30 }
  0x6f   : > { %p63_p9 = scmp.eq.s32.totalorder %s62_s26, 0  ;;  %p73_p12 = scmp.eq.s32.totalorder %s2023_s16, 0 }
  0x70   : > { %p2583_p2 = scmp.eq.s32.totalorder %s2139_s17, 1  ;;  %p1723_p4 = scmp.lt.s32.totalorder %s2023_s16, 2 }
  0x71   : > { %s2282_s18 = scalar_select %p63_p9, %s2019_s15, %s65_s20  }
  0x72   : > { %p2276_p1 = por %p2583_p2, %p72_p13  ;;  %p74_p6 = por %p73_p12, %p72_p13 }
  0x73   : > { %s455_s14 = sand.u32 1, %s2019_s15   ;;  %s1563_s13 = sshll.u32 %s2023_s16, 9 }
  0x74   : > { %s1518_s23 = sshll.u32 %s455_s14, 5  ;;  %s2289_s28 = scalar_lea.hbm %s2551_s1, %s1563_s13 }
  0x75   : > { %s459_s12 = scalar_lea.vmem [#allocation2], %s1518_s23  ;;  %p2293_p11 = pnand %p1723_p4, %p74_p6 }
  0x76   : > { %s466_s29 = sshll.u32 %s459_s12, 4  ;;  %s2297_s20 = scalar_lea.sflag [#allocation3], %s455_s14  ;;  %s2291_s29 = int_to_ptr.vmem [resolvable:$true] %s466_s29 }
  0x77   : > { %s1919_s26 = scalar_lea.hbm %s2289_s28, 512  ;;  %p1921_p0 = pneg %p2293_p11 }
  0x78   : > { %p1920_p8 = scmp.ne.s32.totalorder %s2289_s28, %s1919_s26  ;;  %s1924_s25 = scalar_lea.hbm %s2551_s1, 1024 }
  0x79   : > { %p1925_p7 = scmp.lt.u32.totalorder %s2289_s28, %s2551_s1  ;;  %p1926_p10 = scmp.lt.u32.totalorder %s1924_s25, %s1919_s26 }
  0x7a   : > { %p1922_p3 = pnand %p1921_p0, %p1920_p8  ;;  %p1928_p9 = scmp.lt.u32.totalorder %s1919_s26, %s2289_s28 }
  0x7b   : > { %p1927_p13 = por %p1926_p10, %p1925_p7 }
  0x7c   : > { %p1923_p5 = pneg %p1922_p3 }
  0x7d   : > { %p1929_p12 = por %p1928_p9, %p1927_p13 }
  0x7f   : > { %p1930_p2 = pnand %p1929_p12, %p1923_p5 }
  0x81   : > { %1933 = shalt.err (!%p1930_p2)
}
  0x82   : > { %s1934_s14 = scalar_lea.vmem %s2291_s29, 512  ;;  %s2029_s23 = smov [#allocation2]  }
  0x83   : > { %p1935_p4 = scmp.ne.s32.totalorder %s2291_s29, %s1934_s14  ;;  %s1939_s13 = sshll.u32 %s2029_s23, 4  ;;  %s1940_s13 = int_to_ptr.vmem [resolvable:$false] %s1939_s13 }
  0x84   : > { %s1941_s11 = scalar_lea.vmem %s1940_s13, 1024  ;;  %p1942_p3 = scmp.lt.s32.totalorder %s2291_s29, %s1940_s13 }
  0x85   : > { %p1937_p6 = pnand %p1935_p4, %p1921_p0  ;;  %p1943_p7 = scmp.lt.s32.totalorder %s1941_s11, %s1934_s14 }
  0x87   : > { %p1938_p8 = pneg %p1937_p6  ;;  %p1944_p10 = por %p1943_p7, %p1942_p3 }
  0x89   : > { %p1945_p13 = pnand %p1944_p10, %p1938_p8 }
  0x8b   : > { %1948 = shalt.err (!%p1945_p13)
}
  0x8c   : > { %s2030_s26 = smov 128   ;;  %s2031_s25 = smov 8  }
  0x8d   : > { %1714 = dma.hbm_to_vmem [thread:$0]  (!%p2293_p11), %s2289_s28, 512, %s2291_s29, %s2297_s20, %s2030_s26, %s2030_s26, %s2031_s25  }
  0x8e   : > { %p2586_p0 = scmp.ne.s32.totalorder %s2580_s21, 0 }
  0x8f   : > { %s2328_s12 = sand.u32 (!%p2586_p0), 1, %s2015_s30   ;;  %p2587_p5 = scmp.ne.s32.totalorder (!%p2586_p0), %s2577_s19, 0 }
  0x90   : > { %478 = sbr.rel (%p2586_p0) target bundleno = 2783 (0xadf), region = 76  ;;  %s1522_s14 = sshll.u32 (!%p2586_p0), %s2328_s12, 5 }
  0x91   : > { %s481_s23 = scalar_lea.sflag (!%p2586_p0), [#allocation3], %s2328_s12  ;;  %s2332_s13 = scalar_lea.vmem (!%p2586_p0), [#allocation2], %s1522_s14 }
  0x97   : > { %1994 = dma.done.wait (%p2587_p5), %s481_s23, 512  }
  0x98   : > { %1996 = vsyncadd (%p2587_p5), %s481_s23, 4294966784  ;;  %p2588_p11 = scmp.eq.s32.totalorder %s2139_s17, 0 }
  0x9a   : > { %1998 = dma.done.wait (%p2588_p11), [#allocation6], 32   ;;  %p2589_p9 = pmov %p2588_p11 }
  0x9c   : > { %2000 = vsyncadd (%p2589_p9), [#allocation6], 4294967264  ;;  %p2590_p12 = pmov %p2589_p9 }
  0x9d   : > { %p2591_p2 = pmov %p2589_p9 }
  0x9e   : > { %2002 = dma.done.wait (%p2590_p12), [#allocation9], 32  }
  0x9f   : > { %2004 = vsyncadd (%p2591_p2), [#allocation9], 4294967264  ;;  %p549_p4 = scmp.lt.s32.totalorder %s2139_s17, 1  ;;  %vm557_vm0 = vcmask 261120   ;;  %v1777_v7 = vld [vmem:[%s2554_s4] sm:$0xff]   ;;  %v2032_v8 = vmov 0.0  }
  0xa0   : > { %1594 = vmatprep.subr.bf16.mxu0 %v2032_v8  ;;  %vm2033_vm1 = vmmov 0   ;;  %v1778_v9 = vld [vmem:[%s2554_s4 + $0x8] sm:$0xff]   ;;  %1602 = vmatprep.subr.bf16.mxu1 %v2032_v8  ;;  %v1529_v14 = vld [vmem:[%s2552_s2] ss:$0 sm:$0xff]  ;;  %s2034_s29 = smov 104   ;;  %s2035_s19 = smov 120  }
  0xa1   : > { %s550_s21 = scalar_select %p549_p4, %s2139_s17, 1  ;;  %1598 = vmatprep.mubr.msk.bf16.mxu0 %vm2033_vm1, %v2032_v8  ;;  %1595 = vmatpush3.bf16.msra.mxu0 %v1777_v7  ;;  %v1530_v16 = vld [vmem:[%s2553_s3] ss:$0 sm:$0xff]  ;;  %vm674_vm2 = vcmask 64512   ;;  %v668_v48 = vld [vmem:[%s2332_s13 + $0x8] sm:$0xff]  ;;  %v669_v53 = vld [vmem:[%s2332_s13 + $0x10] sm:$0xff] }
  0xa2   : > { %1596 = vmatprep.subr.bf16.mxu0 %v2032_v8  ;;  %1604 = vmatprep.mubr.msk.bf16.mxu1 %vm2033_vm1, %v2032_v8  ;;  %v1531_v20 = vld [vmem:[#allocation5] ss:$0 sm:$0xff]  ;;  %s2037_s20 = smov 96   ;;  %v670_v60 = vld [vmem:[%s2332_s13 + $0x18] sm:$0xff]  ;;  %s2038_s11 = smov 64   ;;  %vm921_vm3 = vcmask 1043456  }
  0xa3   : > { %s1528_s28 = sshll.u32 %s550_s21, 3  ;;  %v667_v41 = vld [vmem:[%s2332_s13] sm:$0xff]  ;;  %s2039_s23 = smov 8   ;;  %vm1122_vm4 = vcmask 130048   ;;  %vm1124_vm5 = vcmask 195584   ;;  %vm1331_vm6 = vcmask 523264  }
  0xa4   : > { %s552_s22 = scalar_lea.vmem %s2550_s0, %s1528_s28  ;;  %s2040_s21 = smov 16  }
  0xa5   : > { %v2351_v0 = vld [vmem:[%s552_s22] sm:$0xff]  ;;  %1597 = vmatpush3.bf16.msra.mxu0 %v1778_v9  ;;  %s2036_s22 = smov 112   ;;  %s2041_s28 = smov 24  }
  0xa6   : > { %v558_v1 = vsel %vm557_vm0, %v2351_v0, 0.0  ;;  %1608 = vmatprep.subr.bf16.mxu0 %v2032_v8  ;;  %s2592_s26 = sld [smem:[#allocation19_spill]]  ;;  %s2594_s14 = sld [smem:[#allocation20_spill]] }
  0xa7   : > { %559 = vadd.xlane.f32.xlu0 %v558_v1  ;;  %s2042_s13 = smov [#allocation11]  }
  0xa8   : > { %s1953_s25 = sshll.u32 %s2042_s13, 4  ;;  %s1954_s25 = int_to_ptr.vmem [resolvable:$false] %s1953_s25 }
 0x134   : > { %v560_v2 = vpop.xlane.xlu0 %559 }
 0x135   : > { %v562_v3 = vmul.f32 0.03125, %v560_v2 }
 0x137   : > { %v563_v4 = vsub.f32 %v2351_v0, %v562_v3 }
 0x139   : > { %v564_v5 = vmul.f32 %v563_v4, %v563_v4 }
 0x13b   : > { %v565_v6 = vsel %vm557_vm0, %v564_v5, 0.0 }
 0x13c   : > { %566 = vadd.xlane.f32.xlu0 %v565_v6 }
 0x1c9   : > { %v567_v10 = vpop.xlane.xlu0 %566 }
 0x1ca   : > { %v568_v11 = vmul.f32 0.03125, %v567_v10 }
 0x1cc   : > { %v569_v12 = vadd.f32 1e-06, %v568_v11 }
 0x1ce   : > { %1787 = vrsqrt.f32 %v569_v12 }
 0x1d8   : > { %v1788_v13 = vpop.eup %1787 }
 0x1d9   : > { %v571_v15 = vmul.f32 %v1788_v13, %v563_v4 }
 0x1db   : > { %v578_v17 = vmul.f32 %v1529_v14, %v571_v15 }
 0x1dd   : > { %v585_v18 = vadd.f32 %v1530_v16, %v578_v17 }
 0x1df   : > { %v586_v19 = vpack.c.bf16 %v585_v18, %v585_v18 }
 0x1e1   : > { %1599 = vmatmul.mubr.msk.bf16.vlgmr.msra.gmra.mrb[0].mxu0 %vm557_vm0, %v586_v19 }
 0x1e2   : > { %1610 = vmatprep.mubr.msk.bf16.mxu0 %vm2033_vm1, %v2032_v8 }
 0x2b4   : > { %v647_v21 = vpop.f32.mrb[0].mxu0 }
 0x2b5   : > { %v648_v22 = vadd.f32 %v1531_v20, %v647_v21  ;;  %v1600_v23 = vpop.f32.mrb[1].mxu0 }
 0x2b6   : > { %v650_v24 = vpop.f32.mrb[2].mxu0 }
 0x2b7   : > { %660 = vrot.lane.b32.xlu0 %v648_v22, %s2034_s29  ;;  %654 = vrot.lane.b32.xlu1 %v648_v22, %s2035_s19  ;;  %v1601_v25 = vpop.f32.mrb[3].mxu0  ;;  %v2380_v26 = vpack.c.bf16 %v648_v22, %v648_v22 }
 0x2bb   : > { %657 = vrot.lane.b32.xlu1 %v648_v22, %s2036_s22  ;;  %s2595_s22 = sld [smem:[#allocation21_spill]] }
 0x2bf   : > { %672 = vrot.lane.b32.xlu1 %v2380_v26, %s2037_s20 }
 0x329   : > { %v655_v27 = vpop.permute.xlu1 %654  ;;  %v661_v31 = vpop.permute.xlu0 %660 }
 0x32a   : > { %v2383_v28 = vpack.c.bf16 %v655_v27, %v655_v27  ;;  %v2389_v33 = vpack.c.bf16 %v661_v31, %v661_v31 }
 0x32c   : > { %722 = vrot.lane.b32.xlu1 %v2383_v28, %s2037_s20 }
 0x32d   : > { %v658_v29 = vpop.permute.xlu1 %657 }
 0x32e   : > { %v2386_v30 = vpack.c.bf16 %v658_v29, %v658_v29 }
 0x330   : > { %771 = vrot.lane.b32.xlu1 %v2386_v30, %s2037_s20 }
 0x331   : > { %v673_v32 = vpop.permute.xlu1 %672 }
 0x332   : > { %v679_v34 = vsel %vm674_vm2, %v673_v32, 0 }
 0x333   : > { %1603 = vmatpush3.bf16.xpose.msra.mxu1 %v679_v34 }
 0x334   : > { %820 = vrot.lane.b32.xlu1 %v2389_v33, %s2037_s20  ;;  %1614 = vmatprep.subr.bf16.mxu1 %v2032_v8  ;;  %s2593_s20 = sld [smem:[#allocation18_spill]] }
 0x33a   : > { %1605 = vmatmul.mubr.msk.bf16.vlgmr.msra.gmra.mrb[0].mxu1 %vm674_vm2, %v2380_v26 }
 0x33b   : > { %1616 = vmatprep.mubr.msk.bf16.mxu1 %vm2033_vm1, %v2032_v8 }
 0x39e   : > { %v723_v35 = vpop.permute.xlu1 %722 }
 0x39f   : > { %v728_v36 = vsel %vm674_vm2, %v723_v35, 0 }
 0x3a0   : > { %1609 = vmatpush3.bf16.xpose.msra.mxu0 %v728_v36 }
 0x3a1   : > { %1620 = vmatprep.subr.bf16.mxu0 %v2032_v8 }
 0x3a2   : > { %v772_v37 = vpop.permute.xlu1 %771 }
 0x3a3   : > { %v777_v38 = vsel %vm674_vm2, %v772_v37, 0 }
 0x3a4   : > { %1615 = vmatpush3.bf16.xpose.msra.mxu1 %v777_v38 }
 0x3a5   : > { %1626 = vmatprep.subr.bf16.mxu1 %v2032_v8 }
 0x3a6   : > { %v821_v39 = vpop.permute.xlu1 %820 }
 0x3a7   : > { %v826_v40 = vsel %vm674_vm2, %v821_v39, 0  ;;  %1611 = vmatmul.mubr.msk.bf16.vlgmr.msra.gmra.mrb[4].mxu0 %vm674_vm2, %v2383_v28 }
 0x3a8   : > { %1621 = vmatpush3.bf16.xpose.msra.mxu0 %v826_v40  ;;  %1622 = vmatprep.mubr.msk.bf16.mxu0 %vm2033_vm1, %v2032_v8 }
 0x3a9   : > { %1632 = vmatprep.subr.bf16.mxu0 %v2032_v8 }
 0x3ab   : > { %1617 = vmatmul.mubr.msk.bf16.vlgmr.msra.gmra.mrb[4].mxu1 %vm674_vm2, %v2386_v30 }
 0x3ac   : > { %1628 = vmatprep.mubr.msk.bf16.mxu1 %vm2033_vm1, %v2032_v8 }
 0x3af   : > { %1623 = vmatmul.mubr.msk.bf16.vlgmr.msra.gmra.mrb[8].mxu0 %vm674_vm2, %v2389_v33 }
 0x3b0   : > { %1634 = vmatprep.mubr.msk.bf16.mxu0 %vm2033_vm1, %v2032_v8 }
 0x40d   : > { %v715_v42 = vpop.f32.mrb[0].mxu1 }
 0x40e   : > { %v716_v43 = vadd.f32 %v715_v42, %v667_v41  ;;  %v1606_v44 = vpop.f32.mrb[1].mxu1 }
 0x40f   : > { %v718_v45 = vpop.f32.mrb[2].mxu1 }
 0x410   : > { %v1607_v46 = vpop.f32.mrb[3].mxu1  ;;  %v868_v47 = vsel %vm674_vm2, %v716_v43, -inf }
 0x411   : > { %869 = vmax.xlane.f32.xlu1 %v868_v47 }
 0x47a   : > { %v764_v49 = vpop.f32.mrb[4].mxu0 }
 0x47b   : > { %v765_v50 = vadd.f32 %v764_v49, %v668_v48  ;;  %v1612_v51 = vpop.f32.mrb[5].mxu0 }
 0x47c   : > { %v767_v52 = vpop.f32.mrb[6].mxu0 }
 0x47d   : > { %v1613_v54 = vpop.f32.mrb[7].mxu0  ;;  %v871_v55 = vsel %vm674_vm2, %v765_v50, -inf }
 0x47e   : > { %v813_v56 = vpop.f32.mrb[4].mxu1  ;;  %872 = vmax.xlane.f32.xlu0 %v871_v55  ;;  %v1779_v55 = vld [vmem:[%s2556_s6] sm:$0xff]  }
 0x47f   : > { %v814_v57 = vadd.f32 %v813_v56, %v669_v53  ;;  %v1618_v58 = vpop.f32.mrb[5].mxu1  ;;  %v1780_v56 = vld [vmem:[%s2556_s6 + $0x8] sm:$0xff]  }
 0x480   : > { %v816_v59 = vpop.f32.mrb[6].mxu1 }
 0x481   : > { %v1619_v61 = vpop.f32.mrb[7].mxu1  ;;  %v874_v62 = vsel %vm674_vm2, %v814_v57, -inf }
 0x482   : > { %875 = vmax.xlane.f32.xlu1 %v874_v62  ;;  %v862_v63 = vpop.f32.mrb[8].mxu0 }
 0x483   : > { %v863_v1 = vadd.f32 %v862_v63, %v670_v60  ;;  %v1624_v2 = vpop.f32.mrb[9].mxu0 }
 0x484   : > { %v865_v3 = vpop.f32.mrb[10].mxu0 }
 0x485   : > { %v1625_v4 = vpop.f32.mrb[11].mxu0  ;;  %v877_v5 = vsel %vm674_vm2, %v863_v1, -inf }
 0x486   : > { %878 = vmax.xlane.f32.xlu0 %v877_v5 }
 0x493   : > { %916 = vrot.lane.b32.xlu1 %v2380_v26, %s2038_s11 }
 0x49e   : > { %v870_v6 = vpop.xlane.xlu1 %869 }
 0x49f   : > { %v880_v7 = vsub.f32 %v716_v43, %v870_v6 }
 0x4a1   : > { %v884_v9 = vmul.f32 1.442695, %v880_v7 }
 0x4a3   : > { %1789 = vpow2.f32 %v884_v9 }
 0x4ad   : > { %v1790_v10 = vpop.eup %1789 }
 0x4ae   : > { %v892_v11 = vsel %vm674_vm2, %v1790_v10, 0.0 }
 0x4b7   : > { %893 = vadd.xlane.f32.xlu1 %v892_v11 }
 0x50b   : > { %v873_v12 = vpop.xlane.xlu0 %872 }
 0x50c   : > { %v881_v13 = vsub.f32 %v765_v50, %v873_v12 }
 0x50e   : > { %v886_v14 = vmul.f32 1.442695, %v881_v13 }
 0x50f   : > { %v876_v15 = vpop.xlane.xlu1 %875 }
 0x510   : > { %1791 = vpow2.f32 %v886_v14  ;;  %v882_v16 = vsub.f32 %v814_v57, %v876_v15  ;;  %v1543_v14 = vld [vmem:[#allocation7] ss:$0 sm:$0xff] }
 0x512   : > { %v888_v17 = vmul.f32 1.442695, %v882_v16 }
 0x513   : > { %v917_v18 = vpop.permute.xlu1 %916  ;;  %v879_v19 = vpop.xlane.xlu0 %878 }
 0x514   : > { %1793 = vpow2.f32 %v888_v17  ;;  %v923_v20 = vsel %vm921_vm3, %v917_v18, 0  ;;  %v883_v21 = vsub.f32 %v863_v1, %v879_v19 }
 0x515   : > { %1627 = vmatpush3.bf16.msra.mxu1 %v923_v20 }
 0x516   : > { %v890_v22 = vmul.f32 1.442695, %v883_v21  ;;  %1638 = vmatprep.subr.bf16.mxu1 %v2032_v8 }
 0x518   : > { %1795 = vpow2.f32 %v890_v22 }
 0x51a   : > { %v1792_v23 = vpop.eup %1791 }
 0x51b   : > { %v895_v24 = vsel %vm674_vm2, %v1792_v23, 0.0 }
 0x51c   : > { %896 = vadd.xlane.f32.xlu0 %v895_v24 }
 0x51e   : > { %v1794_v25 = vpop.eup %1793 }
 0x51f   : > { %v898_v26 = vsel %vm674_vm2, %v1794_v25, 0.0 }
 0x520   : > { %899 = vadd.xlane.f32.xlu1 %v898_v26 }
 0x522   : > { %v1796_v27 = vpop.eup %1795 }
 0x523   : > { %v901_v29 = vsel %vm674_vm2, %v1796_v27, 0.0 }
 0x524   : > { %902 = vadd.xlane.f32.xlu0 %v901_v29  ;;  %v1783_v29 = vld [vmem:[%s2592_s26] sm:$0xff]  }
 0x531   : > { %1013 = vrot.lane.b32.xlu1 %v2386_v30, %s2038_s11 }
 0x535   : > { %1061 = vrot.lane.b32.xlu1 %v2389_v33, %s2038_s11 }
 0x53a   : > { %965 = vrot.lane.b32.xlu0 %v2383_v28, %s2038_s11  ;;  %s1527_s11 = sshll.u32 %s2328_s12, 3 }
 0x544   : > { %v894_v31 = vpop.xlane.xlu1 %893 }
 0x545   : > { %1797 = vrcp.f32 %v894_v31  ;;  %v1784_v31 = vld [vmem:[%s2592_s26 + $0x8] sm:$0xff]  }
 0x54f   : > { %v1798_v32 = vpop.eup %1797 }
 0x550   : > { %v905_v34 = vmul.f32 %v1798_v32, %v1790_v10 }
 0x552   : > { %v912_v35 = vpack.c.bf16 %v905_v34, %v905_v34 }
 0x554   : > { %1629 = vmatmul.mubr.msk.bf16.vlgmr.msra.gmra.mrb[8].mxu1 %vm674_vm2, %v912_v35 }
 0x555   : > { %1640 = vmatprep.mubr.msk.bf16.mxu1 %vm2033_vm1, %v2032_v8 }
 0x5a9   : > { %v897_v36 = vpop.xlane.xlu0 %896 }
 0x5aa   : > { %1799 = vrcp.f32 %v897_v36 }
 0x5ad   : > { %v900_v37 = vpop.xlane.xlu1 %899 }
 0x5ae   : > { %1801 = vrcp.f32 %v900_v37  ;;  %v1547_v37 = vld [vmem:[#allocation8] ss:$0 sm:$0xff] }
 0x5b1   : > { %v1014_v30 = vpop.permute.xlu1 %1013  ;;  %v903_v38 = vpop.xlane.xlu0 %902 }
 0x5b2   : > { %v1019_v33 = vsel %vm921_vm3, %v1014_v30, 0  ;;  %1803 = vrcp.f32 %v903_v38  ;;  %v1548_v38 = vld [vmem:[#allocation10] ss:$0 sm:$0xff] }
 0x5b3   : > { %1639 = vmatpush3.bf16.msra.mxu1 %v1019_v33 }
 0x5b4   : > { %v1800_v28 = vpop.eup %1799  ;;  %1650 = vmatprep.subr.bf16.mxu1 %v2032_v8 }
 0x5b5   : > { %v907_v39 = vmul.f32 %v1800_v28, %v1792_v23  ;;  %v966_v40 = vpop.permute.xlu0 %965  ;;  %v1062_v42 = vpop.permute.xlu1 %1061 }
 0x5b6   : > { %v971_v41 = vsel %vm921_vm3, %v966_v40, 0  ;;  %v1067_v46 = vsel %vm921_vm3, %v1062_v42, 0  ;;  %v1785_v40 = vld [vmem:[%s2592_s26 + $0x10] sm:$0xff]   ;;  %v1549_v42 = vld [vmem:[%s2593_s20] ss:$0 sm:$0xff] }
 0x5b7   : > { %1633 = vmatpush3.bf16.msra.mxu0 %v971_v41  ;;  %v913_v43 = vpack.c.bf16 %v907_v39, %v907_v39  ;;  %v1786_v41 = vld [vmem:[%s2592_s26 + $0x18] sm:$0xff]  }
 0x5b8   : > { %v1802_v44 = vpop.eup %1801  ;;  %1644 = vmatprep.subr.bf16.mxu0 %v2032_v8 }
 0x5b9   : > { %v909_v45 = vmul.f32 %v1802_v44, %v1794_v25 }
 0x5ba   : > { %1635 = vmatmul.mubr.msk.bf16.vlgmr.msra.gmra.mrb[12].mxu0 %vm674_vm2, %v913_v43 }
 0x5bb   : > { %1645 = vmatpush3.bf16.msra.mxu0 %v1067_v46  ;;  %v914_v47 = vpack.c.bf16 %v909_v45, %v909_v45  ;;  %1646 = vmatprep.mubr.msk.bf16.mxu0 %vm2033_vm1, %v2032_v8 }
 0x5bc   : > { %v1804_v48 = vpop.eup %1803  ;;  %1658 = vmatprep.subr.bf16.mxu0 %v2032_v8 }
 0x5bd   : > { %v911_v49 = vmul.f32 %v1804_v48, %v1796_v27  ;;  %1641 = vmatmul.mubr.msk.bf16.vlgmr.msra.gmra.mrb[12].mxu1 %vm674_vm2, %v914_v47  ;;  %v1781_v27 = vld [vmem:[%s2560_s10] sm:$0xff]  }
 0x5be   : > { %1654 = vmatprep.mubr.msk.bf16.mxu1 %vm2033_vm1, %v2032_v8  ;;  %1651 = vmatpush3.bf16.msra.mxu1 %v1779_v55 }
 0x5bf   : > { %v915_v50 = vpack.c.bf16 %v911_v49, %v911_v49  ;;  %1652 = vmatprep.subr.bf16.mxu1 %v2032_v8 }
 0x5c2   : > { %1647 = vmatmul.mubr.msk.bf16.vlgmr.msra.gmra.mrb[16].mxu0 %vm674_vm2, %v915_v50  ;;  %1653 = vmatpush3.bf16.msra.mxu1 %v1780_v56 }
 0x5c3   : > { %1662 = vmatprep.mubr.msk.bf16.mxu0 %vm2033_vm1, %v2032_v8  ;;  %1666 = vmatprep.subr.bf16.mxu1 %v2032_v8 }
 0x5c4   : > { %1659 = vmatpush3.bf16.msra.mxu0 %v1781_v27 }
 0x5c5   : > { %1660 = vmatprep.subr.bf16.mxu0 %v2032_v8 }
 0x627   : > { %v959_v51 = vpop.f32.mrb[8].mxu1 }
 0x628   : > { %v1630_v52 = vpop.f32.mrb[9].mxu1 }
 0x629   : > { %v962_v53 = vpop.f32.mrb[10].mxu1 }
 0x62a   : > { %v1631_v54 = vpop.f32.mrb[11].mxu1 }
 0x68d   : > { %v1007_v57 = vpop.f32.mrb[12].mxu0 }
 0x68e   : > { %1110 = vrot.lane.b32.xlu0 %v1007_v57, %s2039_s23  ;;  %v1636_v58 = vpop.f32.mrb[13].mxu0  ;;  %s1560_s23 = sshll.u32 %s2139_s17, 7  ;;  %s1378_s17 = scalar_lea.sflag [#allocation4], %s2328_s12 }
 0x68f   : > { %v1010_v59 = vpop.f32.mrb[14].mxu0  ;;  %s2505_s20 = scalar_lea.hbm %s2595_s22, %s1560_s23 }
 0x690   : > { %v1637_v60 = vpop.f32.mrb[15].mxu0  ;;  %v1055_v61 = vpop.f32.mrb[12].mxu1 }
 0x691   : > { %1114 = vrot.lane.b32.xlu1 %v1055_v61, %s2040_s21  ;;  %v1642_v62 = vpop.f32.mrb[13].mxu1  ;;  %s548_s21 = scalar_lea.vmem [#allocation11], %s1527_s11 }
 0x692   : > { %v1058_v63 = vpop.f32.mrb[14].mxu1 }
 0x693   : > { %v1643_v1 = vpop.f32.mrb[15].mxu1 }
 0x695   : > { %v1103_v2 = vpop.f32.mrb[16].mxu0 }
 0x696   : > { %1118 = vrot.lane.b32.xlu0 %v1103_v2, %s2041_s28  ;;  %v1648_v3 = vpop.f32.mrb[17].mxu0  ;;  %s1391_s28 = sshll.u32 %s548_s21, 4  ;;  %s2507_s28 = int_to_ptr.vmem [resolvable:$true] %s1391_s28 }
 0x697   : > { %v1106_v4 = vpop.f32.mrb[18].mxu0  ;;  %s1949_s11 = scalar_lea.vmem %s2507_s28, 128  ;;  %p1956_p7 = scmp.lt.s32.totalorder %s2507_s28, %s1954_s25 }
 0x698   : > { %v1649_v5 = vpop.f32.mrb[19].mxu0  ;;  %p1950_p6 = scmp.ne.s32.totalorder %s2507_s28, %s1949_s11 }
 0x69a   : > { %p1951_p8 = pnand %p1950_p6, %p2276_p1 }
 0x69c   : > { %p1952_p3 = pneg %p1951_p8 }
 0x700   : > { %v1111_v6 = vpop.permute.xlu0 %1110 }
 0x701   : > { %v1121_v9 = vsel %vm674_vm2, %v959_v51, %v1111_v6 }
 0x703   : > { %v1115_v7 = vpop.permute.xlu1 %1114 }
 0x704   : > { %v1123_v10 = vsel %vm1122_vm4, %v1121_v9, %v1115_v7 }
 0x708   : > { %v1119_v11 = vpop.permute.xlu0 %1118 }
 0x709   : > { %v1125_v12 = vsel %vm1124_vm5, %v1123_v10, %v1119_v11 }
 0x70a   : > { %v1126_v13 = vpack.c.bf16 %v1125_v12, %v1125_v12 }
 0x70c   : > { %1655 = vmatmul.mubr.msk.bf16.vlgmr.msra.gmra.mrb[16].mxu1 %vm557_vm0, %v1126_v13 }
 0x70d   : > { %1674 = vmatprep.mubr.msk.bf16.mxu1 %vm2033_vm1, %v2032_v8  ;;  %1667 = vmatpush3.bf16.msra.mxu1 %v1783_v29 }
 0x70e   : > { %1668 = vmatprep.subr.bf16.mxu1 %v2032_v8 }
 0x711   : > { %1669 = vmatpush3.bf16.msra.mxu1 %v1784_v31 }
 0x712   : > { %1670 = vmatprep.subr.bf16.mxu1 %v2032_v8 }
 0x715   : > { %1671 = vmatpush3.bf16.msra.mxu1 %v1785_v40 }
 0x716   : > { %1672 = vmatprep.subr.bf16.mxu1 %v2032_v8  ;;  %v1553_v8 = vld [vmem:[%s2594_s14] ss:$0 sm:$0xff]  ;;  %s1955_s14 = scalar_lea.vmem %s1954_s25, 256 }
 0x717   : > { %p1957_p10 = scmp.lt.s32.totalorder %s1955_s14, %s1949_s11 }
 0x719   : > { %1673 = vmatpush3.bf16.msra.mxu1 %v1786_v41  ;;  %p1958_p13 = por %p1957_p10, %p1956_p7 }
 0x71b   : > { %p1959_p0 = pnand %p1958_p13, %p1952_p3 }
 0x7df   : > { %v1187_v15 = vpop.f32.mrb[16].mxu1 }
 0x7e0   : > { %v1188_v16 = vadd.f32 %v1543_v14, %v1187_v15  ;;  %v1656_v17 = vpop.f32.mrb[17].mxu1 }
 0x7e1   : > { %v1190_v18 = vpop.f32.mrb[18].mxu1 }
 0x7e2   : > { %v1193_v19 = vadd.f32 %v1188_v16, %v2351_v0  ;;  %v1657_v20 = vpop.f32.mrb[19].mxu1  ;;  %v1782_v0 = vld [vmem:[%s2560_s10 + $0x8] sm:$0xff]  }
 0x7e3   : > { %1661 = vmatpush3.bf16.msra.mxu0 %v1782_v0 }
 0x7e4   : > { %v1196_v21 = vsel %vm557_vm0, %v1193_v19, 0.0 }
 0x7e5   : > { %1197 = vadd.xlane.f32.xlu1 %v1196_v21 }
 0x872   : > { %v1198_v22 = vpop.xlane.xlu1 %1197 }
 0x873   : > { %v1199_v23 = vmul.f32 0.03125, %v1198_v22 }
 0x875   : > { %v1200_v24 = vsub.f32 %v1193_v19, %v1199_v23 }
 0x877   : > { %v1201_v25 = vmul.f32 %v1200_v24, %v1200_v24 }
 0x879   : > { %v1202_v26 = vsel %vm557_vm0, %v1201_v25, 0.0 }
 0x87a   : > { %1203 = vadd.xlane.f32.xlu0 %v1202_v26 }
 0x907   : > { %v1204_v32 = vpop.xlane.xlu0 %1203 }
 0x908   : > { %v1205_v34 = vmul.f32 0.03125, %v1204_v32 }
 0x90a   : > { %v1206_v35 = vadd.f32 1e-06, %v1205_v34 }
 0x90c   : > { %1805 = vrsqrt.f32 %v1206_v35 }
 0x916   : > { %v1806_v36 = vpop.eup %1805 }
 0x917   : > { %v1208_v30 = vmul.f32 %v1806_v36, %v1200_v24 }
 0x919   : > { %v1215_v33 = vmul.f32 %v1547_v37, %v1208_v30 }
 0x91b   : > { %v1222_v28 = vadd.f32 %v1548_v38, %v1215_v33 }
 0x91d   : > { %v1223_v39 = vpack.c.bf16 %v1222_v28, %v1222_v28 }
 0x91f   : > { %1663 = vmatmul.mubr.msk.bf16.vlgmr.msra.gmra.mrb[20].mxu0 %vm557_vm0, %v1223_v39 }
 0x9f2   : > { %v1284_v43 = vpop.f32.mrb[20].mxu0 }
 0x9f3   : > { %v1285_v44 = vadd.f32 %v1549_v42, %v1284_v43  ;;  %v1664_v45 = vpop.f32.mrb[21].mxu0 }
 0x9f4   : > { %v1287_v46 = vpop.f32.mrb[22].mxu0 }
 0x9f5   : > { %v1290_v47 = vmax.f32 %v1285_v44, 0.0  ;;  %v1665_v48 = vpop.f32.mrb[23].mxu0 }
 0x9f7   : > { %v1291_v49 = vpack.c.bf16 %v1290_v47, %v1290_v47 }
 0x9f9   : > { %1675 = vmatmul.mubr.msk.bf16.vlgmr.msra.gmra.mrb[20].mxu1 %vm1331_vm6, %v1291_v49 }
 0xacc   : > { %v1369_v50 = vpop.f32.mrb[20].mxu1 }
 0xacd   : > { %v1370_v51 = vadd.f32 %v1553_v8, %v1369_v50  ;;  %v1676_v52 = vpop.f32.mrb[21].mxu1 }
 0xace   : > { %v1372_v53 = vpop.f32.mrb[22].mxu1 }
 0xacf   : > { %v1375_v54 = vadd.f32 %v1370_v51, %v1193_v19  ;;  %v1677_v55 = vpop.f32.mrb[23].mxu1 }
 0xad1   : > { %1376 = vst.msk [vmem:[%s548_s21] sm:$0xff] %vm557_vm0, %v1375_v54 }
 0xad2   : > { %1962 = shalt.err (!%p1959_p0)
}
 0xad3   : > { %s1963_s12 = scalar_lea.hbm %s2505_s20, 128  ;;  %s1967_s29 = scalar_lea.hbm %s2595_s22, 256 }
 0xad4   : > { %p1964_p5 = scmp.ne.s32.totalorder %s2505_s20, %s1963_s12  ;;  %p1968_p12 = scmp.lt.u32.totalorder %s2505_s20, %s2595_s22 }
 0xad5   : > { %p1969_p2 = scmp.lt.u32.totalorder %s1967_s29, %s1963_s12  ;;  %p1971_p6 = scmp.lt.u32.totalorder %s1963_s12, %s2505_s20 }
 0xad6   : > { %p1965_p11 = pnand %p1964_p5, %p2276_p1 }
 0xad7   : > { %p1970_p4 = por %p1969_p2, %p1968_p12 }
 0xad8   : > { %p1966_p9 = pneg %p1965_p11 }
 0xad9   : > { %p1972_p8 = por %p1971_p6, %p1970_p4 }
 0xadb   : > { %p1973_p3 = pnand %p1972_p8, %p1966_p9 }
 0xadd   : > { %1976 = shalt.err (!%p1973_p3)
}
 0xade   : > { %1696 = dma.vmem_to_hbm [thread:$0]  (%p2276_p1), %s2507_s28, 128, %s2505_s20, %s1378_s17  }
 0xadf PF: > { %s2596_s11 = sld [smem:[#allocation16_spill]]  ;;  %s2597_s25 = sld [smem:[#allocation17_spill]] }
 0xae0   : > { %p2599_p10 = scmp.ge.s32.totalorder %s2023_s16, 2 }
 0xae5   : > { %s1403_s14 = sand.u32 1, %s2596_s11   ;;  %p2598_p7 = scmp.ne.s32.totalorder %s2597_s25, 0 }
 0xae6   : > { %s1404_s23 = scalar_lea.sflag [#allocation4], %s1403_s14 }
 0xae7   : > { %p1716_p13 = pnand %p2599_p10, %p2598_p7 }
 0xae9   : > { %2006 = dma.done.wait (!%p1716_p13), %s1404_s23, 128  }
 0xaea   : > { %2008 = vsyncadd (!%p1716_p13), %s1404_s23, 4294967168  ;;  %p29_p0 = scmp.ge.s32.totalorder %s2266_s24, 4   ;;  %s2600_s29 = smov %s2015_s30 }
 0xaeb   : > { %s2601_s30 = smov %s2019_s15  ;;  %s2602_s15 = smov %s2282_s18 }
 0xaec   : > { %s2603_s16 = smov %s2266_s24  ;;  %31 = sbr.rel (!%p29_p0) target bundleno = 12 (0xc), region = 140 }
 0xaf3   :  { %1409 = vsyncpa [#allocation3], 1 }
 0xaf4   :  { %1411 = vsyncpa [#allocation3 + $0x1], 1 }
 0xaf5   :  { %1412 = vsyncpa [#allocation6], 1 }
 0xaf6   :  { %1413 = vsyncpa [#allocation9], 1 }
 0xaf7   :  { %1414 = vsyncpa [#allocation4], 1 }
 0xaf8   :  { %1416 = vsyncpa [#allocation4 + $0x1], 1 }

</bundles_post_ra>
